<compile_context>
chip_gen: v5e
topology: v5e:2x2
jax: 0.10.0
libtpu: 0.0.40
codegen_flags: <defaults>
</compile_context>

<pallas_src>
import numpy as np
import jax
import jax.numpy as jnp
from jax.experimental import pallas as pl
from jax.experimental.pallas import tpu as pltpu

# ---- static configuration (stand-ins for the module's globals) -------------
B, C, H, W = 2, 4, 16, 16      # batch, channels, spatial
NC = 8                         # number of classes
K = 32                         # feature channels (stand-in for layer4 output)
AVG_Y, AVG_X, AVG_H, AVG_W = 4, 4, 8, 8   # crop region (globals in the module)
THRESHOLD = 0.5                # global `threshold`
LAMDA = 0.7                    # global `lamda`
HW = H * W
BHW = B * HW
CROP_AREA = float(AVG_H * AVG_W)

# static crop-region mask (compile-time constant, computed once on host)
_rows = np.arange(H, dtype=np.int32).reshape(H, 1)
_cols = np.arange(W, dtype=np.int32).reshape(1, W)
CROP_MASK = ((_rows >= AVG_Y) & (_rows < AVG_Y + AVG_H) &
             (_cols >= AVG_X) & (_cols < AVG_X + AVG_W)
             ).astype(np.float32).reshape(1, HW)


def _loss_kernel(labels_ref, preds_ref,                       # SMEM (B,) int32
                 x_ref, logits_ref, wfeat_ref, wcls_ref,      # VMEM
                 mask_ref,                                    # VMEM (1, HW)
                 loss_ref):                                   # VMEM (1, 128)
    # ---- batched feature extraction: one (K,C) x (C, B*HW) MXU matmul -------
    feats = jnp.maximum(
        jnp.dot(wfeat_ref[...], x_ref[...],
                preferred_element_type=jnp.float32),
        0.0)                                                   # (K, B*HW)

    mask = mask_ref[...]                                       # (1, HW) f32
    logits_all = logits_ref[...].astype(jnp.float32)           # (B, NC)
    cls_iota = jax.lax.broadcasted_iota(jnp.int32, (1, NC), 1)

    total = jnp.float32(0.0)
    # B is tiny and static: fully unrolled inside this single grid step.
    for b in range(B):
        label = labels_ref[b]                                  # int32 scalar
        pred = preds_ref[b]                                    # int32 scalar

        # -- CAM for the predicted class: classifier-row sublane slice -------
        wrow = wcls_ref[pl.ds(pred, 1), :]                     # (1, K)
        feats_b = feats[:, b * HW:(b + 1) * HW]                # (K, HW), static lane-aligned slice
        cam = jnp.maximum(
            jnp.dot(wrow, feats_b, preferred_element_type=jnp.float32),
            0.0)                                               # (1, HW)

        # per-image min/max normalisation (as pytorch_grad_cam does)
        mn = jnp.min(cam)
        mx = jnp.max(cam)
        cam_n = (cam - mn) / (mx - mn + 1e-7)

        # -- red-area ratio inside the (precomputed constant) crop region ----
        red = jnp.sum(jnp.where(cam_n > THRESHOLD, mask, 0.0))
        ratio = red / CROP_AREA
        loss_attent = (1.0 - ratio) * label.astype(jnp.float32)

        # -- cross entropy on outputs[b] --------------------------------------
        logits_b = logits_all[b:b + 1, :]                      # (1, NC)
        m = jnp.max(logits_b)
        lse = m + jnp.log(jnp.sum(jnp.exp(logits_b - m)))
        logit_y = jnp.sum(jnp.where(cls_iota == label, logits_b, 0.0))
        loss_ce = lse - logit_y

        total = total + LAMDA * loss_ce + (1.0 - LAMDA) * loss_attent

    mean_loss = (total * (1.0 / B)).astype(jnp.float32)
    loss_ref[...] = jnp.broadcast_to(mean_loss, (1, 128))


@jax.jit
def custom_loss_ne(images, outputs, labels, predictions, w_feat, w_cls):
    """images (B,C,H,W) f32, outputs (B,NC) f32, labels/predictions (B,) i32."""
    # Wrapper-side layout plumbing: lane-dense (C, B*HW) operand so the kernel
    # never reshapes across (8,128) tile boundaries.
    x_flat = jnp.transpose(images.reshape(B, C, HW), (1, 0, 2)).reshape(C, BHW)
    crop_mask = jnp.asarray(CROP_MASK)

    out = pl.pallas_call(
        _loss_kernel,
        out_shape=jax.ShapeDtypeStruct((1, 128), jnp.float32),
        grid=(1,),
        in_specs=[
            pl.BlockSpec(memory_space=pltpu.MemorySpace.SMEM),   # labels
            pl.BlockSpec(memory_space=pltpu.MemorySpace.SMEM),   # predictions
            pl.BlockSpec((C, BHW), lambda i: (0, 0)),            # x_flat
            pl.BlockSpec((B, NC), lambda i: (0, 0)),             # logits
            pl.BlockSpec((K, C), lambda i: (0, 0)),              # w_feat
            pl.BlockSpec((NC, K), lambda i: (0, 0)),             # w_cls
            pl.BlockSpec((1, HW), lambda i: (0, 0)),             # crop mask
        ],
        out_specs=pl.BlockSpec((1, 128), lambda i: (0, 0)),
        compiler_params=pltpu.CompilerParams(
            dimension_semantics=("arbitrary",)),
    )(labels, predictions, x_flat, outputs, w_feat, w_cls, crop_mask)

    return out[0, 0]


if __name__ == "__main__":
    key = jax.random.PRNGKey(0)
    k_img, k_out, k_lbl, k_prd, k_wf, k_wc = jax.random.split(key, 6)

    images = jax.random.normal(k_img, (B, C, H, W), dtype=jnp.float32)
    outputs = jax.random.normal(k_out, (B, NC), dtype=jnp.float32)
    labels = jax.random.randint(k_lbl, (B,), 0, NC, dtype=jnp.int32)
    predictions = jax.random.randint(k_prd, (B,), 0, NC, dtype=jnp.int32)

    # deterministic synthetic "model" parameters
    w_feat = jax.random.normal(k_wf, (K, C), dtype=jnp.float32) * 0.1
    w_cls = jax.random.normal(k_wc, (NC, K), dtype=jnp.float32) * 0.1

    loss = custom_loss_ne(images, outputs, labels, predictions, w_feat, w_cls)
    jax.block_until_ready(loss)
    assert loss.shape == () and jnp.isfinite(loss)
    print("KERNEL_OK")
</pallas_src>

<mosaic_0001>
module attributes {stable_mosaic.version = 11 : i64} {
  func.func @_loss_kernel(%arg0: i32, %arg1: memref<2xi32, #tpu.memory_space<smem>>, %arg2: memref<2xi32, #tpu.memory_space<smem>>, %arg3: memref<4x512xf32, #tpu.memory_space<vmem>>, %arg4: memref<2x8xf32, #tpu.memory_space<vmem>>, %arg5: memref<32x4xf32, #tpu.memory_space<vmem>>, %arg6: memref<8x32xf32, #tpu.memory_space<vmem>>, %arg7: memref<1x256xf32, #tpu.memory_space<vmem>>, %arg8: memref<1x128xf32, #tpu.memory_space<vmem>>) attributes {dimension_semantics = [#tpu.dimension_semantics<arbitrary>], iteration_bounds = array<i64: 1>, scalar_prefetch = 0 : i64, scratch_operands = 0 : i64, tpu.core_type = #tpu.core_type<tc>, window_params = [{transform_indices = @transform_0, window_bounds = array<i64: 2>}, {transform_indices = @transform_1, window_bounds = array<i64: 2>}, {pipeline_mode = #tpu.pipeline_mode<synchronous>, transform_indices = @transform_2, window_bounds = array<i64: 4, 512>}, {pipeline_mode = #tpu.pipeline_mode<synchronous>, transform_indices = @transform_3, window_bounds = array<i64: 2, 8>}, {pipeline_mode = #tpu.pipeline_mode<synchronous>, transform_indices = @transform_4, window_bounds = array<i64: 32, 4>}, {pipeline_mode = #tpu.pipeline_mode<synchronous>, transform_indices = @transform_5, window_bounds = array<i64: 8, 32>}, {pipeline_mode = #tpu.pipeline_mode<synchronous>, transform_indices = @transform_6, window_bounds = array<i64: 1, 256>}, {pipeline_mode = #tpu.pipeline_mode<synchronous>, transform_indices = @transform_7, window_bounds = array<i64: 1, 128>}]} {
    %c0 = arith.constant 0 : index
    %c0_0 = arith.constant 0 : index
    %0 = vector.load %arg5[%c0, %c0_0] : memref<32x4xf32, #tpu.memory_space<vmem>>, vector<32x4xf32>
    %c0_1 = arith.constant 0 : index
    %c0_2 = arith.constant 0 : index
    %1 = vector.load %arg3[%c0_1, %c0_2] : memref<4x512xf32, #tpu.memory_space<vmem>>, vector<4x512xf32>
    %cst = arith.constant dense<0.000000e+00> : vector<32x512xf32>
    %2 = tpu.matmul %0, %1, %cst {dimension_numbers = #tpu.dot_dimension_numbers<[1], [0], [0], [1], [0, 0, 1, 1], [], []>} : vector<32x4xf32>, vector<4x512xf32>, vector<32x512xf32> -> vector<32x512xf32>
    %cst_3 = arith.constant 0.000000e+00 : f32
    %3 = vector.broadcast %cst_3 : f32 to vector<32x512xf32>
    %4 = arith.maximumf %2, %3 : vector<32x512xf32>
    %c0_4 = arith.constant 0 : index
    %c0_5 = arith.constant 0 : index
    %5 = vector.load %arg7[%c0_4, %c0_5] : memref<1x256xf32, #tpu.memory_space<vmem>>, vector<1x256xf32>
    %c0_6 = arith.constant 0 : index
    %c0_7 = arith.constant 0 : index
    %6 = vector.load %arg4[%c0_6, %c0_7] : memref<2x8xf32, #tpu.memory_space<vmem>>, vector<2x8xf32>
    %7 = tpu.iota {dimensions = array<i32: 1>} : vector<1x8xi32>
    %c0_8 = arith.constant 0 : index
    %8 = memref.load %arg1[%c0_8] : memref<2xi32, #tpu.memory_space<smem>>
    %c0_9 = arith.constant 0 : index
    %9 = memref.load %arg2[%c0_9] : memref<2xi32, #tpu.memory_space<smem>>
    %10 = arith.index_cast %9 : i32 to index
    %c0_10 = arith.constant 0 : index
    %11 = vector.load %arg6[%10, %c0_10] : memref<8x32xf32, #tpu.memory_space<vmem>>, vector<1x32xf32>
    %12 = vector.extract_strided_slice %4 {offsets = [0, 0], sizes = [32, 256], strides = [1, 1]} : vector<32x512xf32> to vector<32x256xf32>
    %cst_11 = arith.constant dense<0.000000e+00> : vector<1x256xf32>
    %13 = tpu.matmul %11, %12, %cst_11 {dimension_numbers = #tpu.dot_dimension_numbers<[1], [0], [0], [1], [0, 0, 1, 1], [], []>} : vector<1x32xf32>, vector<32x256xf32>, vector<1x256xf32> -> vector<1x256xf32>
    %cst_12 = arith.constant 0.000000e+00 : f32
    %14 = vector.broadcast %cst_12 : f32 to vector<1x256xf32>
    %15 = arith.maximumf %13, %14 : vector<1x256xf32>
    %16 = vector.shape_cast %15 : vector<1x256xf32> to vector<1x1x256xf32>
    %cst_13 = arith.constant dense<0x7F800000> : vector<1xf32>
    %17 = vector.multi_reduction <minimumf>, %16, %cst_13 [1, 2] : vector<1x1x256xf32> to vector<1xf32>
    %18 = vector.shape_cast %17 : vector<1xf32> to vector<1x1x1xf32>
    %19 = vector.extract %18[0, 0, 0] : f32 from vector<1x1x1xf32>
    %20 = vector.shape_cast %15 : vector<1x256xf32> to vector<1x1x256xf32>
    %cst_14 = arith.constant dense<0xFF800000> : vector<1xf32>
    %21 = vector.multi_reduction <maximumf>, %20, %cst_14 [1, 2] : vector<1x1x256xf32> to vector<1xf32>
    %22 = vector.shape_cast %21 : vector<1xf32> to vector<1x1x1xf32>
    %23 = vector.extract %22[0, 0, 0] : f32 from vector<1x1x1xf32>
    %24 = vector.broadcast %19 : f32 to vector<1x256xf32>
    %25 = arith.subf %15, %24 : vector<1x256xf32>
    %26 = arith.subf %23, %19 : f32
    %cst_15 = arith.constant 1.000000e-07 : f32
    %27 = arith.addf %26, %cst_15 : f32
    %28 = vector.broadcast %27 : f32 to vector<1x256xf32>
    %29 = arith.divf %25, %28 : vector<1x256xf32>
    %cst_16 = arith.constant 5.000000e-01 : f32
    %30 = vector.broadcast %cst_16 : f32 to vector<1x256xf32>
    %31 = arith.cmpf ogt, %29, %30 : vector<1x256xf32>
    %cst_17 = arith.constant 0.000000e+00 : f32
    %32 = vector.broadcast %cst_17 : f32 to vector<1x256xf32>
    %33 = arith.select %31, %5, %32 : vector<1x256xi1>, vector<1x256xf32>
    %34 = vector.shape_cast %33 : vector<1x256xf32> to vector<1x1x256xf32>
    %cst_18 = arith.constant dense<0.000000e+00> : vector<1xf32>
    %35 = vector.multi_reduction <add>, %34, %cst_18 [1, 2] : vector<1x1x256xf32> to vector<1xf32>
    %36 = vector.shape_cast %35 : vector<1xf32> to vector<1x1x1xf32>
    %37 = vector.extract %36[0, 0, 0] : f32 from vector<1x1x1xf32>
    %cst_19 = arith.constant 6.400000e+01 : f32
    %38 = arith.divf %37, %cst_19 : f32
    %cst_20 = arith.constant 1.000000e+00 : f32
    %39 = arith.subf %cst_20, %38 : f32
    %40 = arith.sitofp %8 : i32 to f32
    %41 = arith.mulf %39, %40 : f32
    %42 = vector.extract_strided_slice %6 {offsets = [0, 0], sizes = [1, 8], strides = [1, 1]} : vector<2x8xf32> to vector<1x8xf32>
    %43 = vector.shape_cast %42 : vector<1x8xf32> to vector<1x1x8xf32>
    %cst_21 = arith.constant dense<0xFF800000> : vector<1xf32>
    %44 = vector.multi_reduction <maximumf>, %43, %cst_21 [1, 2] : vector<1x1x8xf32> to vector<1xf32>
    %45 = vector.shape_cast %44 : vector<1xf32> to vector<1x1x1xf32>
    %46 = vector.extract %45[0, 0, 0] : f32 from vector<1x1x1xf32>
    %47 = vector.broadcast %46 : f32 to vector<1x8xf32>
    %48 = arith.subf %42, %47 : vector<1x8xf32>
    %49 = math.exp %48 : vector<1x8xf32>
    %50 = vector.shape_cast %49 : vector<1x8xf32> to vector<1x1x8xf32>
    %cst_22 = arith.constant dense<0.000000e+00> : vector<1xf32>
    %51 = vector.multi_reduction <add>, %50, %cst_22 [1, 2] : vector<1x1x8xf32> to vector<1xf32>
    %52 = vector.shape_cast %51 : vector<1xf32> to vector<1x1x1xf32>
    %53 = vector.extract %52[0, 0, 0] : f32 from vector<1x1x1xf32>
    %54 = math.log %53 : f32
    %55 = arith.addf %46, %54 : f32
    %56 = vector.broadcast %8 : i32 to vector<1x8xi32>
    %57 = arith.cmpi eq, %7, %56 : vector<1x8xi32>
    %cst_23 = arith.constant 0.000000e+00 : f32
    %58 = vector.broadcast %cst_23 : f32 to vector<1x8xf32>
    %59 = arith.select %57, %42, %58 : vector<1x8xi1>, vector<1x8xf32>
    %60 = vector.shape_cast %59 : vector<1x8xf32> to vector<1x1x8xf32>
    %cst_24 = arith.constant dense<0.000000e+00> : vector<1xf32>
    %61 = vector.multi_reduction <add>, %60, %cst_24 [1, 2] : vector<1x1x8xf32> to vector<1xf32>
    %62 = vector.shape_cast %61 : vector<1xf32> to vector<1x1x1xf32>
    %63 = vector.extract %62[0, 0, 0] : f32 from vector<1x1x1xf32>
    %64 = arith.subf %55, %63 : f32
    %cst_25 = arith.constant 0.699999988 : f32
    %65 = arith.mulf %cst_25, %64 : f32
    %cst_26 = arith.constant 0.000000e+00 : f32
    %66 = arith.addf %cst_26, %65 : f32
    %cst_27 = arith.constant 3.000000e-01 : f32
    %67 = arith.mulf %cst_27, %41 : f32
    %68 = arith.addf %66, %67 : f32
    %c1 = arith.constant 1 : index
    %69 = memref.load %arg1[%c1] : memref<2xi32, #tpu.memory_space<smem>>
    %c1_28 = arith.constant 1 : index
    %70 = memref.load %arg2[%c1_28] : memref<2xi32, #tpu.memory_space<smem>>
    %71 = arith.index_cast %70 : i32 to index
    %c0_29 = arith.constant 0 : index
    %72 = vector.load %arg6[%71, %c0_29] : memref<8x32xf32, #tpu.memory_space<vmem>>, vector<1x32xf32>
    %73 = vector.extract_strided_slice %4 {offsets = [0, 256], sizes = [32, 256], strides = [1, 1]} : vector<32x512xf32> to vector<32x256xf32>
    %cst_30 = arith.constant dense<0.000000e+00> : vector<1x256xf32>
    %74 = tpu.matmul %72, %73, %cst_30 {dimension_numbers = #tpu.dot_dimension_numbers<[1], [0], [0], [1], [0, 0, 1, 1], [], []>} : vector<1x32xf32>, vector<32x256xf32>, vector<1x256xf32> -> vector<1x256xf32>
    %cst_31 = arith.constant 0.000000e+00 : f32
    %75 = vector.broadcast %cst_31 : f32 to vector<1x256xf32>
    %76 = arith.maximumf %74, %75 : vector<1x256xf32>
    %77 = vector.shape_cast %76 : vector<1x256xf32> to vector<1x1x256xf32>
    %cst_32 = arith.constant dense<0x7F800000> : vector<1xf32>
    %78 = vector.multi_reduction <minimumf>, %77, %cst_32 [1, 2] : vector<1x1x256xf32> to vector<1xf32>
    %79 = vector.shape_cast %78 : vector<1xf32> to vector<1x1x1xf32>
    %80 = vector.extract %79[0, 0, 0] : f32 from vector<1x1x1xf32>
    %81 = vector.shape_cast %76 : vector<1x256xf32> to vector<1x1x256xf32>
    %cst_33 = arith.constant dense<0xFF800000> : vector<1xf32>
    %82 = vector.multi_reduction <maximumf>, %81, %cst_33 [1, 2] : vector<1x1x256xf32> to vector<1xf32>
    %83 = vector.shape_cast %82 : vector<1xf32> to vector<1x1x1xf32>
    %84 = vector.extract %83[0, 0, 0] : f32 from vector<1x1x1xf32>
    %85 = vector.broadcast %80 : f32 to vector<1x256xf32>
    %86 = arith.subf %76, %85 : vector<1x256xf32>
    %87 = arith.subf %84, %80 : f32
    %cst_34 = arith.constant 1.000000e-07 : f32
    %88 = arith.addf %87, %cst_34 : f32
    %89 = vector.broadcast %88 : f32 to vector<1x256xf32>
    %90 = arith.divf %86, %89 : vector<1x256xf32>
    %cst_35 = arith.constant 5.000000e-01 : f32
    %91 = vector.broadcast %cst_35 : f32 to vector<1x256xf32>
    %92 = arith.cmpf ogt, %90, %91 : vector<1x256xf32>
    %cst_36 = arith.constant 0.000000e+00 : f32
    %93 = vector.broadcast %cst_36 : f32 to vector<1x256xf32>
    %94 = arith.select %92, %5, %93 : vector<1x256xi1>, vector<1x256xf32>
    %95 = vector.shape_cast %94 : vector<1x256xf32> to vector<1x1x256xf32>
    %cst_37 = arith.constant dense<0.000000e+00> : vector<1xf32>
    %96 = vector.multi_reduction <add>, %95, %cst_37 [1, 2] : vector<1x1x256xf32> to vector<1xf32>
    %97 = vector.shape_cast %96 : vector<1xf32> to vector<1x1x1xf32>
    %98 = vector.extract %97[0, 0, 0] : f32 from vector<1x1x1xf32>
    %cst_38 = arith.constant 6.400000e+01 : f32
    %99 = arith.divf %98, %cst_38 : f32
    %cst_39 = arith.constant 1.000000e+00 : f32
    %100 = arith.subf %cst_39, %99 : f32
    %101 = arith.sitofp %69 : i32 to f32
    %102 = arith.mulf %100, %101 : f32
    %103 = vector.extract_strided_slice %6 {offsets = [1, 0], sizes = [1, 8], strides = [1, 1]} : vector<2x8xf32> to vector<1x8xf32>
    %104 = vector.shape_cast %103 : vector<1x8xf32> to vector<1x1x8xf32>
    %cst_40 = arith.constant dense<0xFF800000> : vector<1xf32>
    %105 = vector.multi_reduction <maximumf>, %104, %cst_40 [1, 2] : vector<1x1x8xf32> to vector<1xf32>
    %106 = vector.shape_cast %105 : vector<1xf32> to vector<1x1x1xf32>
    %107 = vector.extract %106[0, 0, 0] : f32 from vector<1x1x1xf32>
    %108 = vector.broadcast %107 : f32 to vector<1x8xf32>
    %109 = arith.subf %103, %108 : vector<1x8xf32>
    %110 = math.exp %109 : vector<1x8xf32>
    %111 = vector.shape_cast %110 : vector<1x8xf32> to vector<1x1x8xf32>
    %cst_41 = arith.constant dense<0.000000e+00> : vector<1xf32>
    %112 = vector.multi_reduction <add>, %111, %cst_41 [1, 2] : vector<1x1x8xf32> to vector<1xf32>
    %113 = vector.shape_cast %112 : vector<1xf32> to vector<1x1x1xf32>
    %114 = vector.extract %113[0, 0, 0] : f32 from vector<1x1x1xf32>
    %115 = math.log %114 : f32
    %116 = arith.addf %107, %115 : f32
    %117 = vector.broadcast %69 : i32 to vector<1x8xi32>
    %118 = arith.cmpi eq, %7, %117 : vector<1x8xi32>
    %cst_42 = arith.constant 0.000000e+00 : f32
    %119 = vector.broadcast %cst_42 : f32 to vector<1x8xf32>
    %120 = arith.select %118, %103, %119 : vector<1x8xi1>, vector<1x8xf32>
    %121 = vector.shape_cast %120 : vector<1x8xf32> to vector<1x1x8xf32>
    %cst_43 = arith.constant dense<0.000000e+00> : vector<1xf32>
    %122 = vector.multi_reduction <add>, %121, %cst_43 [1, 2] : vector<1x1x8xf32> to vector<1xf32>
    %123 = vector.shape_cast %122 : vector<1xf32> to vector<1x1x1xf32>
    %124 = vector.extract %123[0, 0, 0] : f32 from vector<1x1x1xf32>
    %125 = arith.subf %116, %124 : f32
    %cst_44 = arith.constant 0.699999988 : f32
    %126 = arith.mulf %cst_44, %125 : f32
    %127 = arith.addf %68, %126 : f32
    %cst_45 = arith.constant 3.000000e-01 : f32
    %128 = arith.mulf %cst_45, %102 : f32
    %129 = arith.addf %127, %128 : f32
    %cst_46 = arith.constant 5.000000e-01 : f32
    %130 = arith.mulf %129, %cst_46 : f32
    %131 = vector.broadcast %130 : f32 to vector<1x128xf32>
    %c0_47 = arith.constant 0 : index
    %c0_48 = arith.constant 0 : index
    %132 = vector.load %arg8[%c0_47, %c0_48] : memref<1x128xf32, #tpu.memory_space<vmem>>, vector<1x128xf32>
    tpu.vector_store %arg8[%c0_47, %c0_48], %131 {strides = array<i32>} : memref<1x128xf32, #tpu.memory_space<vmem>>, vector<1x128xf32>,
    return
  }
  func.func @transform_0(%arg0: i32) -> i32 {
    %c0_i32 = arith.constant 0 : i32
    %c0_i32_0 = arith.constant 0 : i32
    return %c0_i32 : i32
  }
  func.func @transform_1(%arg0: i32) -> i32 {
    %c0_i32 = arith.constant 0 : i32
    %c0_i32_0 = arith.constant 0 : i32
    return %c0_i32 : i32
  }
  func.func @transform_2(%arg0: i32) -> (i32, i32) {
    %c0_i32 = arith.constant 0 : i32
    %c0_i32_0 = arith.constant 0 : i32
    %c0_i32_1 = arith.constant 0 : i32
    return %c0_i32, %c0_i32_0 : i32, i32
  }
  func.func @transform_3(%arg0: i32) -> (i32, i32) {
    %c0_i32 = arith.constant 0 : i32
    %c0_i32_0 = arith.constant 0 : i32
    %c0_i32_1 = arith.constant 0 : i32
    return %c0_i32, %c0_i32_0 : i32, i32
  }
  func.func @transform_4(%arg0: i32) -> (i32, i32) {
    %c0_i32 = arith.constant 0 : i32
    %c0_i32_0 = arith.constant 0 : i32
    %c0_i32_1 = arith.constant 0 : i32
    return %c0_i32, %c0_i32_0 : i32, i32
  }
  func.func @transform_5(%arg0: i32) -> (i32, i32) {
    %c0_i32 = arith.constant 0 : i32
    %c0_i32_0 = arith.constant 0 : i32
    %c0_i32_1 = arith.constant 0 : i32
    return %c0_i32, %c0_i32_0 : i32, i32
  }
  func.func @transform_6(%arg0: i32) -> (i32, i32) {
    %c0_i32 = arith.constant 0 : i32
    %c0_i32_0 = arith.constant 0 : i32
    %c0_i32_1 = arith.constant 0 : i32
    return %c0_i32, %c0_i32_0 : i32, i32
  }
  func.func @transform_7(%arg0: i32) -> (i32, i32) {
    %c0_i32 = arith.constant 0 : i32
    %c0_i32_0 = arith.constant 0 : i32
    %c0_i32_1 = arith.constant 0 : i32
    return %c0_i32, %c0_i32_0 : i32, i32
  }
}

</mosaic_0001>

<bundles_post_ra>
// kernel: custom_loss_ne.1
= control target key start
LH: loop header
LB: loop body
LE: loop exit
PB: predicated region body
PF: predicated region fallthrough
CT: control target
= control target key end

     0   :  { %12 = vsyncpa [#allocation4], 0  ;;  %s942_s0 = inlined_call_operand.vmem [shape: s32[2], index: 0, kind: input, shape index: {}]   ;;  %s943_s1 = inlined_call_operand.vmem [shape: s32[2], index: 1, kind: input, shape index: {}]   ;;  %s944_s2 = inlined_call_operand.vmem [shape: f32[4,512], index: 2, kind: input, shape index: {}]   ;;  %s945_s3 = inlined_call_operand.vmem [shape: f32[2,8], index: 3, kind: input, shape index: {}]   ;;  %s946_s4 = inlined_call_operand.vmem [shape: f32[32,4], index: 4, kind: input, shape index: {}]   ;;  %s947_s5 = inlined_call_operand.vmem [shape: f32[8,32], index: 5, kind: input, shape index: {}]   ;;  %s948_s6 = inlined_call_operand.vmem [shape: f32[1,256], index: 6, kind: input, shape index: {}]   ;;  %s949_s7 = inlined_call_operand.hbm [shape: f32[1,128], index: 7, kind: output, shape index: {}]  }
   0x1   :  { %13 = vsyncpa [#allocation6], 0 }
   0x2   :  { %14 = vsyncpa [#allocation3], 0  ;;  %s20_s26 = sshll.u32 %s942_s0, 4  ;;  %s29_s29 = sshll.u32 %s943_s1, 4  ;;  %s21_s26 = int_to_ptr.vmem [resolvable:$true] %s20_s26  ;;  %s30_s29 = int_to_ptr.vmem [resolvable:$true] %s29_s29 }
   0x3   :  { %s731_s30 = smov [#allocation2]   ;;  %s732_s8 = smov [#allocation5]  }
   0x4   :  { %23 = dma.vmem_to_smem %s21_s26, 16, %s731_s30, [#allocation4]  }
   0x5   :  { %32 = dma.vmem_to_smem %s30_s29, 16, %s732_s8, [#allocation6]  }
   0x6   :  { %725 = dma.done.wait [#allocation4], 16  }
   0x7   :  { %726 = vsyncadd [#allocation4], 4294967280 }
   0x8   :  { %727 = dma.done.wait [#allocation6], 16  }
   0x9   :  { %728 = vsyncadd [#allocation6], 4294967280 }
   0xa   :  { %51 = sfence }
   0xb   :  { %v56_v0 = vld [vmem:[%s944_s2] sm:$0xff]  ;;  %vm80_vm0 = vcmask 1043456   ;;  %vm67_vm1 = vcmask 31744   ;;  %v798_v4 = vld [vmem:[%s946_s4 + $0x8] sm:$0xff]  ;;  %v807_v5 = vld [vmem:[%s946_s4 + $0x10] sm:$0xff]  ;;  %s226_s17 = sld [smem:[#allocation5]] }
   0xc   :  { %60 = vst [vmem:[#allocation1] ss:$2 sm:$0xff] %v56_v0  ;;  %v787_v1 = vld [vmem:[%s946_s4] sm:$0xff]  ;;  %v816_v6 = vld [vmem:[%s946_s4 + $0x18] sm:$0xff]  ;;  %vm229_vm2 = vcmask 261120   ;;  %vm275_vm3 = vcmask 1040384  }
   0xd   :  { %v57_v34 = vld [vmem:[%s944_s2 + $0x8] sm:$0xff]  ;;  %v855_v59 = vld [vmem:[%s948_s6] sm:$0x3]  ;;  %vm355_vm10 = vcmask 57344   ;;  %s885_s10 = sld [smem:[#allocation2]]  ;;  %vm526_vm13 = vcmask 58369  }
   0xe   :  { %62 = vst [vmem:[#allocation1 + $0x10] ss:$2 sm:$0xff] %v57_v34 }
  0x11   :  { %s227_s19 = scalar_lea.vmem %s947_s5, %s226_s17 }
  0x12   :  { %v228_v23 = vld [vmem:[%s227_s19] sm:$0x1] }
  0x13   :  { %v63_v2 = vld.sshfl [vmem:[#allocation1] sm:$0xff pattern:$0x75316420]  ;;  %v64_v3 = vld.sshfl [vmem:[#allocation1 + $0x8] sm:$0xff pattern:$0x75316420]  ;;  %s353_s12 = scvt.s32.f32 %s885_s10 }
  0x14   :  { %603 = vmatpush.msk.msra.mxu0 %vm80_vm0, %v63_v2  ;;  %608 = vmatpush.msk.msra.mxu1 %vm80_vm0, %v64_v3  ;;  %v325_v2 = vperm.slane %v855_v59, 0  ;;  %v326_v3 = vperm.slane %v855_v59, 1 }
  0x15   :  { %604 = vmatmul.msk.f32.vlgmr.msra.gmra.mxu0 %vm67_vm1, %v787_v1  ;;  %609 = vmatmul.msk.f32.vlgmr.msra.gmra.mxu1 %vm67_vm1, %v787_v1  ;;  %v65_v35 = vld.sshfl [vmem:[#allocation1 + $0x10] sm:$0xff pattern:$0x75316420]  ;;  %v66_v36 = vld.sshfl [vmem:[#allocation1 + $0x18] sm:$0xff pattern:$0x75316420] }
  0x16   :  { %613 = vmatpush.msk.msra.mxu2 %vm80_vm0, %v65_v35  ;;  %618 = vmatpush.msk.msra.mxu3 %vm80_vm0, %v66_v36 }
  0x17   :  { %614 = vmatmul.msk.f32.vlgmr.msra.gmra.mxu2 %vm67_vm1, %v787_v1  ;;  %619 = vmatmul.msk.f32.vlgmr.msra.gmra.mxu3 %vm67_vm1, %v787_v1 }
  0x1d   :  { %605 = vmatmul.msk.f32.gmra.mxu0 %vm67_vm1, %v798_v4  ;;  %610 = vmatmul.msk.f32.gmra.mxu1 %vm67_vm1, %v798_v4 }
  0x1f   :  { %615 = vmatmul.msk.f32.gmra.mxu2 %vm67_vm1, %v798_v4  ;;  %620 = vmatmul.msk.f32.gmra.mxu3 %vm67_vm1, %v798_v4 }
  0x25   :  { %606 = vmatmul.msk.f32.gmra.mxu0 %vm67_vm1, %v807_v5  ;;  %611 = vmatmul.msk.f32.gmra.mxu1 %vm67_vm1, %v807_v5 }
  0x27   :  { %616 = vmatmul.msk.f32.gmra.mxu2 %vm67_vm1, %v807_v5  ;;  %621 = vmatmul.msk.f32.gmra.mxu3 %vm67_vm1, %v807_v5 }
  0x2d   :  { %607 = vmatmul.msk.f32.gmra.mxu0 %vm67_vm1, %v816_v6  ;;  %612 = vmatmul.msk.f32.gmra.mxu1 %vm67_vm1, %v816_v6 }
  0x2f   :  { %617 = vmatmul.msk.f32.gmra.mxu2 %vm67_vm1, %v816_v6  ;;  %622 = vmatmul.msk.f32.gmra.mxu3 %vm67_vm1, %v816_v6 }
  0x92   :  { %v106_v7 = vpop.f32.mrf.mxu0  ;;  %v135_v8 = vpop.f32.mrf.mxu1 }
  0x93   :  { %v205_v21 = vmax.f32 %v106_v7, 0.0  ;;  %v206_v22 = vmax.f32 %v135_v8, 0.0 }
  0x9a   :  { %v109_v9 = vpop.f32.mrf.mxu0  ;;  %v138_v10 = vpop.f32.mrf.mxu1 }
  0x9b   :  { %v209_v19 = vmax.f32 %v109_v9, 0.0  ;;  %v210_v20 = vmax.f32 %v138_v10, 0.0 }
  0xa2   :  { %v112_v11 = vpop.f32.mrf.mxu0  ;;  %v141_v12 = vpop.f32.mrf.mxu1 }
  0xa3   :  { %v213_v17 = vmax.f32 %v112_v11, 0.0  ;;  %v214_v18 = vmax.f32 %v141_v12, 0.0  ;;  %v868_v11 = vld [vmem:[%s945_s3] sm:$0x3]  ;;  %s626_s3 = sld [smem:[#allocation5 + $0x1]] }
  0xa4   :  { %v356_v12 = vsel %vm355_vm10, %v868_v11, -inf }
  0xa9   :  { %s405_s30 = scalar_lea.vmem %s947_s5, %s626_s3 }
  0xaa   :  { %v115_v13 = vpop.f32.mrf.mxu0  ;;  %v144_v14 = vpop.f32.mrf.mxu1 }
  0xab   :  { %v217_v15 = vmax.f32 %v115_v13, 0.0  ;;  %v218_v16 = vmax.f32 %v144_v14, 0.0  ;;  %v164_v13 = vpop.f32.mrf.mxu2  ;;  %v193_v14 = vpop.f32.mrf.mxu3 }
  0xad   :  { %245 = vmatpush.msrb.mxu0 %v217_v15  ;;  %265 = vmatpush.msrb.mxu1 %v218_v16 }
  0xaf   :  { %246 = vmatpush.msrb.mxu0 %v213_v17  ;;  %266 = vmatpush.msrb.mxu1 %v214_v18 }
  0xb1   :  { %247 = vmatpush.msrb.mxu0 %v209_v19  ;;  %267 = vmatpush.msrb.mxu1 %v210_v20 }
  0xb3   :  { %248 = vmatpush.msrb.mxu0 %v205_v21  ;;  %268 = vmatpush.msrb.mxu1 %v206_v22  ;;  %v167_v15 = vpop.f32.mrf.mxu2  ;;  %v196_v16 = vpop.f32.mrf.mxu3 }
  0xb4   :  { %623 = vmatmul.msk.f32.vlgmr.msrb.gmra.mxu0 %vm229_vm2, %v228_v23  ;;  %624 = vmatmul.msk.f32.vlgmr.msrb.gmra.mxu1 %vm229_vm2, %v228_v23 }
  0xbb   :  { %v170_v17 = vpop.f32.mrf.mxu2  ;;  %v199_v18 = vpop.f32.mrf.mxu3 }
  0xbc   :  { %v215_v21 = vmax.f32 %v170_v17, 0.0  ;;  %v216_v22 = vmax.f32 %v199_v18, 0.0 }
  0xc3   :  { %v173_v19 = vpop.f32.mrf.mxu2  ;;  %v202_v20 = vpop.f32.mrf.mxu3 }
  0xc4   :  { %v219_v23 = vmax.f32 %v173_v19, 0.0 }
  0xc6   :  { %422 = vmatpush.msrb.mxu2 %v219_v23 }
  0xc8   :  { %423 = vmatpush.msrb.mxu2 %v215_v21 }
 0x131   :  { %v250_v24 = vpop.f32.mrf.mxu0  ;;  %v270_v25 = vpop.f32.mrf.mxu1 }
 0x132   :  { %v273_v26 = vmax.f32 %v250_v24, 0.0  ;;  %v274_v27 = vmax.f32 %v270_v25, 0.0  ;;  %v220_v24 = vmax.f32 %v202_v20, 0.0  ;;  %v211_v25 = vmax.f32 %v167_v15, 0.0 }
 0x134   :  { %v276_v28 = vsel %vm275_vm3, %v273_v26, inf  ;;  %v277_v29 = vsel %vm275_vm3, %v274_v27, inf  ;;  %v288_v31 = vsel %vm275_vm3, %v273_v26, -inf  ;;  %v289_v32 = vsel %vm275_vm3, %v274_v27, -inf  ;;  %442 = vmatpush.msrb.mxu3 %v220_v24  ;;  %424 = vmatpush.msrb.mxu2 %v211_v25 }
 0x135   :  { %v278_v30 = vmin.f32 %v276_v28, %v277_v29  ;;  %v290_v33 = vmax.f32 %v288_v31, %v289_v32  ;;  %v208_v28 = vmax.f32 %v193_v14, 0.0  ;;  %v406_v29 = vld [vmem:[%s405_s30] sm:$0x1] }
 0x136   :  { %443 = vmatpush.msrb.mxu3 %v216_v22 }
 0x137   :  { %279 = vmin.xlane.f32.xlu0 %v278_v30  ;;  %v733_v30 = vmov 64.0  }
 0x13f   :  { %291 = vmax.xlane.f32.xlu0 %v290_v33 }
 0x1aa   :  { %v280_v37 = vpop.xlane.xlu0 %279 }
 0x1ab   :  { %v281_v38 = vrot.slane %v280_v37, 4 }
 0x1ad   :  { %v282_v39 = vmin.f32 %v280_v37, %v281_v38 }
 0x1af   :  { %v283_v40 = vrot.slane %v282_v39, 2 }
 0x1b1   :  { %v284_v41 = vmin.f32 %v282_v39, %v283_v40 }
 0x1b2   :  { %v292_v42 = vpop.xlane.xlu0 %291 }
 0x1b3   :  { %v293_v43 = vrot.slane %v292_v42, 4  ;;  %v285_v44 = vrot.slane %v284_v41, 1 }
 0x1b5   :  { %v294_v45 = vmax.f32 %v292_v42, %v293_v43  ;;  %v286_v46 = vmin.f32 %v284_v41, %v285_v44 }
 0x1b7   :  { %v295_v47 = vrot.slane %v294_v45, 2  ;;  %629 = vpush %v286_v46 }
 0x1b9   :  { %v296_v48 = vmax.f32 %v294_v45, %v295_v47 }
 0x1bb   :  { %v297_v49 = vrot.slane %v296_v48, 1 }
 0x1bd   :  { %v298_v50 = vmax.f32 %v296_v48, %v297_v49 }
 0x1bf   :  { %631 = vpush %v298_v50 }
 0x1e8   :  { %s630_s2 = spop %629 }
 0x1e9   :  { %v300_v58 = vstv %s630_s2 }
 0x1ea   :  { %v301_v62 = vsub.f32 %v273_v26, %v300_v58  ;;  %v302_v63 = vsub.f32 %v274_v27, %v300_v58  ;;  %v212_v26 = vmax.f32 %v196_v16, 0.0  ;;  %v207_v27 = vmax.f32 %v164_v13, 0.0 }
 0x1ec   :  { %444 = vmatpush.msrb.mxu3 %v212_v26  ;;  %425 = vmatpush.msrb.mxu2 %v207_v27 }
 0x1ed   :  { %627 = vmatmul.msk.f32.vlgmr.msrb.gmra.mxu2 %vm229_vm2, %v406_v29 }
 0x1ee   :  { %445 = vmatpush.msrb.mxu3 %v208_v28 }
 0x1ef   :  { %628 = vmatmul.msk.f32.vlgmr.msrb.gmra.mxu3 %vm229_vm2, %v406_v29 }
 0x1f0   :  { %s632_s22 = spop %631 }
 0x1f1   :  { %s303_s23 = ssub.f32 %s632_s22, %s630_s2 }
 0x1f3   :  { %s304_s24 = sadd.f32 1e-07, %s303_s23 }
 0x1f4   :  { %s921_s23 = sld [smem:[#allocation2 + $0x1]] }
 0x1f5   :  { %v305_v51 = vstv %s304_s24 }
 0x1f6   :  { %663 = vrcp.f32 %v305_v51  ;;  %v317_v55 = vand.u32 2147483648, %v305_v51  ;;  %v315_v57 = vand.u32 2147483647, %v305_v51  ;;  %vm311_vm5 = vweird.f32 %v305_v51 }
 0x1f7   :  { %665 = vrcp.f32 %v733_v30 }
 0x1f8   :  { %v318_v61 = vor.u32 1.1754944e-38, %v317_v55  ;;  %vm316_vm7 = vcmp.eq.f32.partialorder %v315_v57, 8.507059e+37 }
 0x1fa   :  { %s524_s3 = scvt.s32.f32 %s921_s23 }
 0x1fc   :  { %v664_v52 = vpop.eup %663 }
 0x1fd   :  { %v307_v53 = vmul.f32 %v664_v52, %v305_v51  ;;  %vm312_vm4 = vweird.f32 %v664_v52  ;;  %v666_v31 = vpop.eup %665 }
 0x1fe   :  { %vm313_vm6 = vmor %vm311_vm5, %vm312_vm4  ;;  %v344_v32 = vmul.f32 64.0, %v666_v31  ;;  %vm348_vm11 = vweird.f32 %v666_v31 }
 0x1ff   :  { %v308_v54 = vsub.f32 1.0, %v307_v53 }
 0x200   :  { %v345_v33 = vsub.f32 1.0, %v344_v32 }
 0x201   :  { %v309_v56 = vmul.f32 %v664_v52, %v308_v54  ;;  %v223_v54 = vlaneseq }
 0x202   :  { %v346_v37 = vmul.f32 %v666_v31, %v345_v33 }
 0x203   :  { %v310_v60 = vadd.f32 %v664_v52, %v309_v56  ;;  %v887_v55 = vand.u32 127, %v223_v54  ;;  %v385_v56 = vstv %s885_s10 }
 0x204   :  { %v347_v40 = vadd.f32 %v666_v31, %v346_v37 }
 0x205   :  { %v314_v0 = vsel %vm313_vm6, %v664_v52, %v310_v60  ;;  %vm386_vm12 = vcmp.eq.s32.totalorder %v887_v55, %v385_v56 }
 0x206   :  { %v319_v1 = vsel %vm316_vm7, %v318_v61, %v314_v0  ;;  %v349_v46 = vsel %vm348_vm11, %v666_v31, %v347_v40  ;;  %v387_v60 = vsel %vm386_vm12, %v868_v11, 0.0 }
 0x207   :  { %v320_v4 = vmul.f32 %v319_v1, %v301_v62  ;;  %v321_v5 = vmul.f32 %v319_v1, %v302_v63  ;;  %v388_v61 = vsel %vm355_vm10, %v387_v60, 0.0 }
 0x209   :  { %vm322_vm8 = vcmp.gt.f32.partialorder %v320_v4, 0.5  ;;  %vm323_vm9 = vcmp.gt.f32.partialorder %v321_v5, 0.5 }
 0x20a   :  { %v329_v6 = vsel %vm322_vm8, %v325_v2, 0.0  ;;  %v330_v7 = vsel %vm323_vm9, %v326_v3, 0.0 }
 0x20b   :  { %v331_v8 = vsel %vm275_vm3, %v329_v6, 0.0  ;;  %v332_v9 = vsel %vm275_vm3, %v330_v7, 0.0 }
 0x20c   :  { %v333_v10 = vadd.f32 %v332_v9, %v331_v8 }
 0x20e   :  { %334 = vadd.xlane.f32.xlu1 %v333_v10 }
 0x216   :  { %357 = vmax.xlane.f32.xlu1 %v356_v12 }
 0x270   :  { %v427_v62 = vpop.f32.mrf.mxu2 }
 0x271   :  { %v894_v0 = vmax.f32 %v427_v62, 0.0 }
 0x272   :  { %v447_v63 = vpop.f32.mrf.mxu3 }
 0x273   :  { %v896_v1 = vmax.f32 %v447_v63, 0.0  ;;  %v452_v4 = vsel %vm275_vm3, %v894_v0, inf  ;;  %v464_v6 = vsel %vm275_vm3, %v894_v0, -inf }
 0x275   :  { %v453_v5 = vsel %vm275_vm3, %v896_v1, inf  ;;  %v465_v7 = vsel %vm275_vm3, %v896_v1, -inf }
 0x276   :  { %v454_v8 = vmin.f32 %v452_v4, %v453_v5  ;;  %v466_v9 = vmax.f32 %v464_v6, %v465_v7 }
 0x278   :  { %455 = vmin.xlane.f32.xlu0 %v454_v8  ;;  %467 = vmax.xlane.f32.xlu1 %v466_v9 }
 0x281   :  { %v335_v34 = vpop.xlane.xlu1 %334 }
 0x282   :  { %v336_v35 = vrot.slane %v335_v34, 4 }
 0x284   :  { %v337_v36 = vadd.f32 %v336_v35, %v335_v34 }
 0x286   :  { %v338_v38 = vrot.slane %v337_v36, 2 }
 0x288   :  { %v339_v39 = vadd.f32 %v338_v38, %v337_v36 }
 0x289   :  { %v358_v41 = vpop.xlane.xlu1 %357 }
 0x28a   :  { %v359_v42 = vrot.slane %v358_v41, 4  ;;  %v340_v43 = vrot.slane %v339_v39, 1 }
 0x28c   :  { %v360_v44 = vmax.f32 %v358_v41, %v359_v42  ;;  %v341_v45 = vadd.f32 %v340_v43, %v339_v39  ;;  %v527_v42 = vsel %vm526_vm13, %v868_v11, -inf }
 0x28d   :  { %528 = vmax.xlane.f32.xlu0 %v527_v42 }
 0x28e   :  { %v361_v47 = vrot.slane %v360_v44, 2  ;;  %633 = vpush %v341_v45 }
 0x28f   :  { %635 = vpush %v349_v46 }
 0x290   :  { %v362_v48 = vmax.f32 %v360_v44, %v361_v47 }
 0x292   :  { %v363_v49 = vrot.slane %v362_v48, 1 }
 0x294   :  { %v364_v50 = vmax.f32 %v362_v48, %v363_v49 }
 0x296   :  { %637 = vpush %v364_v50 }
 0x2bf   :  { %s877_s5 = spop %633 }
 0x2c0   :  { %s879_s8 = spop %635 }
 0x2c1   :  { %s351_s11 = smul.f32 %s879_s8, %s877_s5 }
 0x2c3   :  { %s352_s1 = ssub.f32 1.0, %s351_s11 }
 0x2c5   :  { %s354_s13 = smul.f32 %s353_s12, %s352_s1  ;;  %s734_s1 = smov [#allocation7]  }
 0x2c6   :  { %s588_s12 = sshll.u32 %s734_s1, 4  ;;  %s589_s12 = int_to_ptr.vmem [resolvable:$true] %s588_s12 }
 0x2c7   :  { %s881_s9 = spop %637  ;;  %s401_s19 = smul.f32 0.3, %s354_s13 }
 0x2c8   :  { %v366_v51 = vstv %s881_s9 }
 0x2c9   :  { %v367_v52 = vsub.f32 %v868_v11, %v366_v51 }
 0x2cb   :  { %v368_v53 = vmul.f32 1.442695, %v367_v52 }
 0x2cd   :  { %667 = vpow2.f32 %v368_v53 }
 0x2d3   :  { %v668_v57 = vpop.eup %667 }
 0x2d4   :  { %v370_v58 = vsel %vm355_vm10, %v668_v57, 0.0 }
 0x2d5   :  { %371 = vadd.xlane.f32.xlu2 %v370_v58 }
 0x2dd   :  { %389 = vadd.xlane.f32.xlu2 %v388_v61 }
 0x2eb   :  { %v456_v19 = vpop.xlane.xlu0 %455  ;;  %v468_v20 = vpop.xlane.xlu1 %467 }
 0x2ec   :  { %v457_v22 = vrot.slane %v456_v19, 4  ;;  %v469_v23 = vrot.slane %v468_v20, 4 }
 0x2ee   :  { %v458_v25 = vmin.f32 %v456_v19, %v457_v22  ;;  %v470_v26 = vmax.f32 %v468_v20, %v469_v23 }
 0x2f0   :  { %v459_v28 = vrot.slane %v458_v25, 2  ;;  %v471_v29 = vrot.slane %v470_v26, 2 }
 0x2f2   :  { %v460_v32 = vmin.f32 %v458_v25, %v459_v28  ;;  %v472_v33 = vmax.f32 %v470_v26, %v471_v29 }
 0x2f4   :  { %v461_v35 = vrot.slane %v460_v32, 1  ;;  %v473_v37 = vrot.slane %v472_v33, 1 }
 0x2f6   :  { %v462_v40 = vmin.f32 %v460_v32, %v461_v35  ;;  %v474_v41 = vmax.f32 %v472_v33, %v473_v37 }
 0x348   :  { %v372_v10 = vpop.xlane.xlu2 %371 }
 0x349   :  { %v373_v12 = vrot.slane %v372_v10, 4 }
 0x34b   :  { %v374_v13 = vadd.f32 %v373_v12, %v372_v10 }
 0x34d   :  { %v375_v14 = vrot.slane %v374_v13, 2 }
 0x34f   :  { %v376_v15 = vadd.f32 %v375_v14, %v374_v13 }
 0x350   :  { %v390_v18 = vpop.xlane.xlu2 %389 }
 0x351   :  { %v377_v16 = vrot.slane %v376_v15, 1  ;;  %v391_v21 = vrot.slane %v390_v18, 4 }
 0x353   :  { %v378_v17 = vadd.f32 %v377_v16, %v376_v15  ;;  %v392_v24 = vadd.f32 %v391_v21, %v390_v18  ;;  %v559_v16 = vstv %s921_s23 }
 0x355   :  { %639 = vpush %v378_v17  ;;  %v393_v27 = vrot.slane %v392_v24, 2 }
 0x357   :  { %v394_v31 = vadd.f32 %v393_v27, %v392_v24 }
 0x359   :  { %v395_v34 = vrot.slane %v394_v31, 1 }
 0x35b   :  { %v396_v39 = vadd.f32 %v395_v34, %v394_v31 }
 0x386   :  { %s640_s0 = spop %639 }
 0x387   :  { %v380_v30 = vstv %s640_s0 }
 0x388   :  { %669 = vlog2.f32 %v380_v30 }
 0x38e   :  { %v670_v36 = vpop.eup %669 }
 0x38f   :  { %v382_v38 = vmul.f32 0.6931472, %v670_v36 }
 0x391   :  { %641 = vpush %v382_v38 }
 0x392   :  { %643 = vpush %v396_v39 }
 0x393   :  { %645 = vpush %v462_v40 }
 0x394   :  { %647 = vpush %v474_v41 }
 0x3c2   :  { %s642_s14 = spop %641 }
 0x3c3   :  { %s384_s15 = sadd.f32 %s642_s14, %s881_s9  ;;  %s644_s16 = spop %643 }
 0x3c4   :  { %s646_s17 = spop %645 }
 0x3c5   :  { %s398_s4 = ssub.f32 %s384_s15, %s644_s16  ;;  %s648_s18 = spop %647  ;;  %v476_v50 = vstv %s646_s17 }
 0x3c6   :  { %s479_s20 = ssub.f32 %s648_s18, %s646_s17  ;;  %v477_v53 = vsub.f32 %v894_v0, %v476_v50  ;;  %v478_v54 = vsub.f32 %v896_v1, %v476_v50  ;;  %v529_v1 = vpop.xlane.xlu0 %528  ;;  %s590_s16 = sshll.u32 %s949_s7, 4  ;;  %s591_s16 = int_to_ptr.hbm [resolvable:$true] %s590_s16 }
 0x3c7   :  { %s399_s21 = smul.f32 0.7, %s398_s4  ;;  %v530_v5 = vrot.slane %v529_v1, 4 }
 0x3c8   :  { %s480_s2 = sadd.f32 1e-07, %s479_s20 }
 0x3c9   :  { %s911_s22 = sadd.f32 %s401_s19, %s399_s21  ;;  %v531_v6 = vmax.f32 %v529_v1, %v530_v5 }
 0x3ca   :  { %v481_v43 = vstv %s480_s2 }
 0x3cb   :  { %671 = vrcp.f32 %v481_v43  ;;  %v493_v47 = vand.u32 2147483648, %v481_v43  ;;  %v491_v49 = vand.u32 2147483647, %v481_v43  ;;  %vm487_vm15 = vweird.f32 %v481_v43 }
 0x3cc   :  { %v532_v8 = vrot.slane %v531_v6, 2 }
 0x3cd   :  { %v494_v52 = vor.u32 1.1754944e-38, %v493_v47  ;;  %vm492_vm1 = vcmp.eq.f32.partialorder %v491_v49, 8.507059e+37 }
 0x3ce   :  { %v533_v12 = vmax.f32 %v531_v6, %v532_v8 }
 0x3d1   :  { %v672_v44 = vpop.eup %671 }
 0x3d2   :  { %v483_v45 = vmul.f32 %v672_v44, %v481_v43  ;;  %vm488_vm14 = vweird.f32 %v672_v44 }
 0x3d3   :  { %vm489_vm0 = vmor %vm487_vm15, %vm488_vm14 }
 0x3d4   :  { %v484_v46 = vsub.f32 1.0, %v483_v45 }
 0x3d6   :  { %v485_v48 = vmul.f32 %v672_v44, %v484_v46 }
 0x3d8   :  { %v486_v51 = vadd.f32 %v672_v44, %v485_v48 }
 0x3da   :  { %v490_v56 = vsel %vm489_vm0, %v672_v44, %v486_v51 }
 0x3db   :  { %v495_v57 = vsel %vm492_vm1, %v494_v52, %v490_v56 }
 0x3dc   :  { %v496_v58 = vmul.f32 %v495_v57, %v477_v53  ;;  %v497_v60 = vmul.f32 %v495_v57, %v478_v54 }
 0x3de   :  { %vm498_vm2 = vcmp.gt.f32.partialorder %v496_v58, 0.5  ;;  %vm499_vm4 = vcmp.gt.f32.partialorder %v497_v60, 0.5 }
 0x3df   :  { %v500_v61 = vsel %vm498_vm2, %v325_v2, 0.0  ;;  %v501_v62 = vsel %vm499_vm4, %v326_v3, 0.0  ;;  %v534_v2 = vrot.slane %v533_v12, 1 }
 0x3e0   :  { %v502_v63 = vsel %vm275_vm3, %v500_v61, 0.0  ;;  %v503_v4 = vsel %vm275_vm3, %v501_v62, 0.0  ;;  %vm560_vm3 = vcmp.eq.s32.totalorder %v887_v55, %v559_v16 }
 0x3e1   :  { %v504_v0 = vadd.f32 %v503_v4, %v502_v63  ;;  %v535_v3 = vmax.f32 %v533_v12, %v534_v2  ;;  %v561_v17 = vsel %vm560_vm3, %v868_v11, 0.0 }
 0x3e2   :  { %v563_v18 = vrot.slane %v561_v17, 1 }
 0x3e3   :  { %505 = vadd.xlane.f32.xlu2 %v504_v0 }
 0x3e4   :  { %v565_v19 = vsel %vm355_vm10, %v563_v18, 0.0 }
 0x3eb   :  { %566 = vadd.xlane.f32.xlu2 %v565_v19 }
 0x456   :  { %v506_v7 = vpop.xlane.xlu2 %505 }
 0x457   :  { %v507_v9 = vrot.slane %v506_v7, 4 }
 0x459   :  { %v508_v10 = vadd.f32 %v507_v9, %v506_v7 }
 0x45b   :  { %v509_v13 = vrot.slane %v508_v10, 2 }
 0x45d   :  { %v510_v14 = vadd.f32 %v509_v13, %v508_v10 }
 0x45e   :  { %v567_v32 = vpop.xlane.xlu2 %566 }
 0x45f   :  { %v511_v15 = vrot.slane %v510_v14, 1 }
 0x461   :  { %v512_v59 = vadd.f32 %v511_v15, %v510_v14 }
 0x463   :  { %649 = vpush %v512_v59 }
 0x464   :  { %651 = vpush %v535_v3 }
 0x494   :  { %s927_s24 = spop %649 }
 0x495   :  { %s929_s25 = spop %651  ;;  %s522_s6 = smul.f32 %s927_s24, %s879_s8 }
 0x496   :  { %v537_v20 = vstv %s929_s25 }
 0x497   :  { %v538_v21 = vsub.f32 %v868_v11, %v537_v20  ;;  %v568_v11 = vrot.slane %v567_v32, 4  ;;  %s523_s27 = ssub.f32 1.0, %s522_s6 }
 0x499   :  { %v539_v22 = vmul.f32 1.442695, %v538_v21  ;;  %v569_v33 = vadd.f32 %v568_v11, %v567_v32  ;;  %s525_s5 = smul.f32 %s524_s3, %s523_s27 }
 0x49b   :  { %673 = vpow2.f32 %v539_v22  ;;  %v570_v34 = vrot.slane %v569_v33, 2  ;;  %s578_s0 = smul.f32 0.3, %s525_s5 }
 0x49d   :  { %v571_v36 = vadd.f32 %v570_v34, %v569_v33 }
 0x49f   :  { %v572_v37 = vrot.slane %v571_v36, 1 }
 0x4a1   :  { %v674_v23 = vpop.eup %673  ;;  %v573_v40 = vadd.f32 %v572_v37, %v571_v36 }
 0x4a2   :  { %v542_v24 = vrot.slane %v674_v23, 1 }
 0x4a4   :  { %v544_v55 = vsel %vm355_vm10, %v542_v24, 0.0 }
 0x4a5   :  { %545 = vadd.xlane.f32.xlu1 %v544_v55 }
 0x518   :  { %v546_v25 = vpop.xlane.xlu1 %545 }
 0x519   :  { %v547_v26 = vrot.slane %v546_v25, 4 }
 0x51b   :  { %v548_v27 = vadd.f32 %v547_v26, %v546_v25 }
 0x51d   :  { %v549_v28 = vrot.slane %v548_v27, 2 }
 0x51f   :  { %v550_v29 = vadd.f32 %v549_v28, %v548_v27 }
 0x521   :  { %v551_v30 = vrot.slane %v550_v29, 1 }
 0x523   :  { %v552_v31 = vadd.f32 %v551_v30, %v550_v29 }
 0x525   :  { %653 = vpush %v552_v31 }
 0x556   :  { %s654_s26 = spop %653 }
 0x557   :  { %v554_v35 = vstv %s654_s26 }
 0x558   :  { %675 = vlog2.f32 %v554_v35 }
 0x55e   :  { %v676_v38 = vpop.eup %675 }
 0x55f   :  { %v556_v39 = vmul.f32 0.6931472, %v676_v38 }
 0x561   :  { %655 = vpush %v556_v39 }
 0x562   :  { %657 = vpush %v573_v40 }
 0x592   :  { %s656_s28 = spop %655 }
 0x593   :  { %s558_s29 = sadd.f32 %s656_s28, %s929_s25  ;;  %s658_s30 = spop %657 }
 0x595   :  { %s575_s9 = ssub.f32 %s558_s29, %s658_s30 }
 0x597   :  { %s576_s10 = smul.f32 0.7, %s575_s9 }
 0x599   :  { %s577_s11 = sadd.f32 %s576_s10, %s911_s22 }
 0x59b   :  { %s579_s13 = sadd.f32 %s578_s0, %s577_s11 }
 0x59d   :  { %s580_s17 = smul.f32 0.5, %s579_s13 }
 0x59f   :  { %v581_v41 = vstv %s580_s17 }
 0x5a0   :  { %582 = vst [vmem:[#allocation7] sm:$0x1] %v581_v41 }
 0x5a1   :  { %593 = dma.vmem_to_hbm [thread:$0]  %s589_s12, 16, %s591_s16, [#allocation3]  }
 0x5a2   :  { %729 = dma.done.wait [#allocation3], 16  }
 0x5a3   :  { %730 = vsyncadd [#allocation3], 4294967280 }
 0x5a4   :  { %598 = vsyncpa [#allocation3], 1 }
 0x5a5   :  { %599 = vsyncpa [#allocation4], 1 }
 0x5a6   :  { %600 = vsyncpa [#allocation6], 1 }

</bundles_post_ra>
